<compile_context>
chip_gen: v5e
topology: v5e:2x2
jax: 0.10.0
libtpu: 0.0.40
codegen_flags: <defaults>
</compile_context>

<pallas_src>
import functools

import jax
import jax.numpy as jnp
from jax.experimental import pallas as pl
from jax.experimental.pallas import tpu as pltpu


def _round_up(x, m):
    return (x + m - 1) // m * m


# --------------------------------------------------------------------------
# Prologue: h = x @ W  and per-node scores  s = h @ [a_src | a_dst]
# --------------------------------------------------------------------------
def _proj_kernel(x_ref, w_ref, a_ref, h_ref, s_ref):
    h = jnp.dot(x_ref[...], w_ref[...], preferred_element_type=jnp.float32)
    s_ref[...] = jnp.dot(h, a_ref[...], preferred_element_type=jnp.float32)
    h_ref[...] = h.astype(h_ref.dtype)


# --------------------------------------------------------------------------
# Main attention kernel, one (TILE_M, N) row-slab per grid step.
# --------------------------------------------------------------------------
def _attn_kernel(s_src_ref, s_dst_ref, h_ref, mask_ref, out_ref, *, alpha, concat):
    # e[i, j] = s_src[i] + s_dst[j]   -- broadcast add (TILE_M,1)+(1,N)
    e = s_src_ref[...] + s_dst_ref[...]
    neg_lrelu = -jnp.where(e > 0.0, e, alpha * e)

    edge = mask_ref[...] > 0                               # int8 -> bool
    logits = jnp.where(edge, neg_lrelu, jnp.float32(-1e30))
    m = jnp.max(logits, axis=1, keepdims=True)
    p = jnp.where(edge, jnp.exp(logits - m), 0.0)
    s = jnp.sum(p, axis=1, keepdims=True)
    # For rows with at least one edge, s >= 1 (the max element contributes 1),
    # so the approximate EUP reciprocal is safe; s > 0 <=> row has an edge.
    inv = pl.reciprocal(jnp.maximum(s, jnp.float32(1e-30)), approx=True)
    att = jnp.where(s > 0, p * inv, 0.0)

    # Final aggregation on the MXU in bf16 with f32 accumulation.
    h_prime = jnp.dot(att.astype(jnp.bfloat16), h_ref[...],
                      preferred_element_type=jnp.float32)

    if concat:
        # F.elu, default alpha=1.  min() keeps the discarded branch finite.
        out = jnp.where(h_prime > 0.0, h_prime,
                        jnp.exp(jnp.minimum(h_prime, 0.0)) - 1.0)
    else:
        out = h_prime
    out_ref[...] = out.astype(out_ref.dtype)


def _attn_vmem_bytes(tile_m, n_pad, f_out_pad):
    mask_b = 2 * tile_m * n_pad * 1            # int8 mask, double-buffered
    h_b = 2 * n_pad * f_out_pad * 2            # resident bf16 h
    out_b = 2 * tile_m * f_out_pad * 4         # f32 output tile
    score_b = 2 * (tile_m + n_pad) * 4
    temps_b = 8 * tile_m * n_pad * 4           # headroom for (TILE_M, N) temps
    return mask_b + h_b + out_b + score_b + temps_b


def sp_graph_attention_layer(x, edge, W, attn, *, alpha=0.2, concat=True):
    """x: (N, F_in), edge: (2, E) int32, W: (F_in, F_out), attn: (2*F_out,).
    Returns (N, F_out) float32."""
    N, F_in = x.shape
    F_out = W.shape[1]

    # ---- padding / tiling choices ---------------------------------------
    tile_m = min(128, _round_up(N, 8))         # row tile (VMEM-friendly on v7x)
    n_pad = _round_up(N, tile_m)
    f_out_pad = _round_up(F_out, 128)          # lane-dense output stores

    x_pad = jnp.zeros((n_pad, F_in), jnp.float32).at[:N, :].set(
        x.astype(jnp.float32))
    w_pad = jnp.zeros((F_in, f_out_pad), jnp.float32).at[:, :F_out].set(
        W.astype(jnp.float32))
    a_src = jnp.zeros((f_out_pad,), jnp.float32).at[:F_out].set(
        attn[:F_out].astype(jnp.float32))
    a_dst = jnp.zeros((f_out_pad,), jnp.float32).at[:F_out].set(
        attn[F_out:].astype(jnp.float32))
    a_cat = jnp.stack([a_src, a_dst], axis=1)  # (f_out_pad, 2)

    # int8 adjacency mask: mask[i, j] = 1 iff edge (i -> j) exists.
    mask = jnp.zeros((n_pad, n_pad), jnp.int8).at[edge[0], edge[1]].set(1)

    grid = (n_pad // tile_m,)

    # ---- prologue: projection + per-node scores --------------------------
    h_bf16, scores = pl.pallas_call(
        _proj_kernel,
        out_shape=(jax.ShapeDtypeStruct((n_pad, f_out_pad), jnp.bfloat16),
                   jax.ShapeDtypeStruct((n_pad, 2), jnp.float32)),
        grid=grid,
        in_specs=[pl.BlockSpec((tile_m, F_in), lambda i: (i, 0)),
                  pl.BlockSpec((F_in, f_out_pad), lambda i: (0, 0)),
                  pl.BlockSpec((f_out_pad, 2), lambda i: (0, 0))],
        out_specs=(pl.BlockSpec((tile_m, f_out_pad), lambda i: (i, 0)),
                   pl.BlockSpec((tile_m, 2), lambda i: (i, 0))),
        compiler_params=pltpu.CompilerParams(
            dimension_semantics=("parallel",)),
    )(x_pad, w_pad, a_cat)

    s_src = scores[:, 0:1]                       # (n_pad, 1)
    s_dst_row = scores[:, 1].reshape(1, n_pad)   # pre-transposed (1, n_pad)

    # ---- main attention kernel -------------------------------------------
    vmem_limit = int(min(64 << 20,
                         max(32 << 20,
                             2 * _attn_vmem_bytes(tile_m, n_pad, f_out_pad))))

    out_pad = pl.pallas_call(
        functools.partial(_attn_kernel, alpha=alpha, concat=concat),
        out_shape=jax.ShapeDtypeStruct((n_pad, f_out_pad), jnp.float32),
        grid=grid,
        in_specs=[pl.BlockSpec((tile_m, 1), lambda i: (i, 0)),      # s_src
                  pl.BlockSpec((1, n_pad), lambda i: (0, 0)),       # s_dst row
                  pl.BlockSpec((n_pad, f_out_pad), lambda i: (0, 0)),  # h (resident)
                  pl.BlockSpec((tile_m, n_pad), lambda i: (i, 0))],  # int8 mask
        out_specs=pl.BlockSpec((tile_m, f_out_pad), lambda i: (i, 0)),
        compiler_params=pltpu.CompilerParams(
            dimension_semantics=("parallel",),
            vmem_limit_bytes=vmem_limit),
    )(s_src, s_dst_row, h_bf16, mask)

    return out_pad[:N, :F_out]


if __name__ == "__main__":
    # Small deterministic problem: N nodes, F_in -> F_out features.
    N, F_IN, F_OUT = 8, 16, 32
    ALPHA = 0.2

    key = jax.random.PRNGKey(0)
    kx, kw, ka = jax.random.split(key, 3)

    x = jax.random.normal(kx, (N, F_IN), jnp.float32)

    # Deterministic parameter init (xavier_normal_ with gain=1.414).
    gain = 1.414
    w_std = gain * (2.0 / (F_IN + F_OUT)) ** 0.5
    W = w_std * jax.random.normal(kw, (F_IN, F_OUT), jnp.float32)
    a_std = gain * (2.0 / (2 * F_OUT)) ** 0.5
    attn = a_std * jax.random.normal(ka, (2 * F_OUT,), jnp.float32)

    # Deterministic edge list (2, E): node i points to (i+1), (i+2), (i+3) mod N.
    src = jnp.repeat(jnp.arange(N, dtype=jnp.int32), 3)
    dst = (src + jnp.tile(jnp.arange(1, 4, dtype=jnp.int32), N)) % N
    edge = jnp.stack([src, dst], axis=0)  # (2, 24)

    out = sp_graph_attention_layer(x, edge, W, attn, alpha=ALPHA, concat=True)
    jax.block_until_ready(out)

    # Cross-check against a pure-JAX f32 reference of the same math.
    h = x @ W
    e = (h @ attn[:F_OUT])[:, None] + (h @ attn[F_OUT:])[None, :]
    vals = -jnp.where(e > 0, e, ALPHA * e)
    mask = jnp.zeros((N, N), jnp.float32).at[edge[0], edge[1]].set(1.0)
    logits = jnp.where(mask > 0, vals, -1e30)
    p = jnp.exp(logits - logits.max(axis=1, keepdims=True)) * mask
    att = jnp.where(mask.sum(1, keepdims=True) > 0,
                    p / jnp.maximum(p.sum(1, keepdims=True), 1e-30), 0.0)
    hp = att @ h
    ref = jnp.where(hp > 0, hp, jnp.exp(hp) - 1.0)
    # Tolerance accounts for the bf16 MXU inputs of the final att @ h matmul
    # (f32 accumulation) and the approx EUP reciprocal in the softmax.
    assert jnp.allclose(out, ref, atol=5e-2, rtol=5e-2), "mismatch vs reference"

    print("KERNEL_OK")
</pallas_src>

<mosaic_0001>
module attributes {stable_mosaic.version = 11 : i64} {
  func.func @_proj_kernel(%arg0: i32, %arg1: memref<8x16xf32, #tpu.memory_space<vmem>>, %arg2: memref<16x128xf32, #tpu.memory_space<vmem>>, %arg3: memref<128x2xf32, #tpu.memory_space<vmem>>, %arg4: memref<8x128xbf16, #tpu.memory_space<vmem>>, %arg5: memref<8x2xf32, #tpu.memory_space<vmem>>) attributes {dimension_semantics = [#tpu.dimension_semantics<parallel>], iteration_bounds = array<i64: 1>, scalar_prefetch = 0 : i64, scratch_operands = 0 : i64, tpu.core_type = #tpu.core_type<tc>, window_params = [{transform_indices = @transform_0, window_bounds = array<i64: 8, 16>}, {pipeline_mode = #tpu.pipeline_mode<synchronous>, transform_indices = @transform_1, window_bounds = array<i64: 16, 128>}, {pipeline_mode = #tpu.pipeline_mode<synchronous>, transform_indices = @transform_2, window_bounds = array<i64: 128, 2>}, {transform_indices = @transform_3, window_bounds = array<i64: 8, 128>}, {transform_indices = @transform_4, window_bounds = array<i64: 8, 2>}]} {
    %c0 = arith.constant 0 : index
    %c0_0 = arith.constant 0 : index
    %0 = vector.load %arg1[%c0, %c0_0] : memref<8x16xf32, #tpu.memory_space<vmem>>, vector<8x16xf32>
    %c0_1 = arith.constant 0 : index
    %c0_2 = arith.constant 0 : index
    %1 = vector.load %arg2[%c0_1, %c0_2] : memref<16x128xf32, #tpu.memory_space<vmem>>, vector<16x128xf32>
    %cst = arith.constant dense<0.000000e+00> : vector<8x128xf32>
    %2 = tpu.matmul %0, %1, %cst {dimension_numbers = #tpu.dot_dimension_numbers<[1], [0], [0], [1], [0, 0, 1, 1], [], []>} : vector<8x16xf32>, vector<16x128xf32>, vector<8x128xf32> -> vector<8x128xf32>
    %c0_3 = arith.constant 0 : index
    %c0_4 = arith.constant 0 : index
    %3 = vector.load %arg3[%c0_3, %c0_4] : memref<128x2xf32, #tpu.memory_space<vmem>>, vector<128x2xf32>
    %cst_5 = arith.constant dense<0.000000e+00> : vector<8x2xf32>
    %4 = tpu.matmul %2, %3, %cst_5 {dimension_numbers = #tpu.dot_dimension_numbers<[1], [0], [0], [1], [0, 0, 1, 1], [], []>} : vector<8x128xf32>, vector<128x2xf32>, vector<8x2xf32> -> vector<8x2xf32>
    %c0_6 = arith.constant 0 : index
    %c0_7 = arith.constant 0 : index
    %5 = vector.load %arg5[%c0_6, %c0_7] : memref<8x2xf32, #tpu.memory_space<vmem>>, vector<8x2xf32>
    tpu.vector_store %arg5[%c0_6, %c0_7], %4 {strides = array<i32>} : memref<8x2xf32, #tpu.memory_space<vmem>>, vector<8x2xf32>,
    %6 = arith.truncf %2 : vector<8x128xf32> to vector<8x128xbf16>
    %c0_8 = arith.constant 0 : index
    %c0_9 = arith.constant 0 : index
    %7 = vector.load %arg4[%c0_8, %c0_9] : memref<8x128xbf16, #tpu.memory_space<vmem>>, vector<8x128xbf16>
    tpu.vector_store %arg4[%c0_8, %c0_9], %6 {strides = array<i32>} : memref<8x128xbf16, #tpu.memory_space<vmem>>, vector<8x128xbf16>,
    return
  }
  func.func @transform_0(%arg0: i32) -> (i32, i32) {
    %c0_i32 = arith.constant 0 : i32
    %c0_i32_0 = arith.constant 0 : i32
    return %arg0, %c0_i32 : i32, i32
  }
  func.func @transform_1(%arg0: i32) -> (i32, i32) {
    %c0_i32 = arith.constant 0 : i32
    %c0_i32_0 = arith.constant 0 : i32
    %c0_i32_1 = arith.constant 0 : i32
    return %c0_i32, %c0_i32_0 : i32, i32
  }
  func.func @transform_2(%arg0: i32) -> (i32, i32) {
    %c0_i32 = arith.constant 0 : i32
    %c0_i32_0 = arith.constant 0 : i32
    %c0_i32_1 = arith.constant 0 : i32
    return %c0_i32, %c0_i32_0 : i32, i32
  }
  func.func @transform_3(%arg0: i32) -> (i32, i32) {
    %c0_i32 = arith.constant 0 : i32
    %c0_i32_0 = arith.constant 0 : i32
    return %arg0, %c0_i32 : i32, i32
  }
  func.func @transform_4(%arg0: i32) -> (i32, i32) {
    %c0_i32 = arith.constant 0 : i32
    %c0_i32_0 = arith.constant 0 : i32
    return %arg0, %c0_i32 : i32, i32
  }
}

</mosaic_0001>

<bundles_post_ra>
// kernel: tpu_custom_call.1
= control target key start
LH: loop header
LB: loop body
LE: loop exit
PB: predicated region body
PF: predicated region fallthrough
CT: control target
= control target key end

     0   :  { %vm20_vm0 = vcmask 130048   ;;  %s221_s0 = inlined_call_operand.vmem [shape: f32[8,16], index: 0, kind: input, shape index: {}]   ;;  %s222_s1 = inlined_call_operand.vmem [shape: f32[16,128], index: 1, kind: input, shape index: {}]   ;;  %s223_s2 = inlined_call_operand.vmem [shape: f32[128,2], index: 2, kind: input, shape index: {}]   ;;  %s224_s3 = inlined_call_operand.hbm [shape: bf16[8,128], index: 3, kind: output, shape index: {0}]   ;;  %s225_s4 = inlined_call_operand.vmem [shape: f32[8,2], index: 4, kind: output, shape index: {1}]  }
   0x1   :  { %v19_v0 = vld [vmem:[%s222_s1 + $0x8] sm:$0xff]  ;;  %v18_v1 = vld [vmem:[%s222_s1] sm:$0xff]  ;;  %v59_v3 = vld [vmem:[%s223_s2 + $0x78] sm:$0xff] }
   0x2   :  { %38 = vmatpush.msra.mxu0 %v19_v0  ;;  %v17_v2 = vld [vmem:[%s221_s0] sm:$0xff]  ;;  %v58_v4 = vld [vmem:[%s223_s2 + $0x70] sm:$0xff]  ;;  %60 = vmatpush.msra.mxu1 %v59_v3  ;;  %v57_v5 = vld [vmem:[%s223_s2 + $0x68] sm:$0xff] }
   0x3   :  { %v56_v6 = vld [vmem:[%s223_s2 + $0x60] sm:$0xff] }
   0x4   :  { %39 = vmatpush.msra.mxu0 %v18_v1  ;;  %61 = vmatpush.msra.mxu1 %v58_v4 }
   0x5   :  { %104 = vmatmul.msk.f32.vlgmr.msra.gmra.mxu0 %vm20_vm0, %v17_v2 }
   0x6   :  { %62 = vmatpush.msra.mxu1 %v57_v5 }
   0x7   :  { %10 = vsyncpa [#allocation3], 0  ;;  %v55_v7 = vld [vmem:[%s223_s2 + $0x58] sm:$0xff]  ;;  %v54_v8 = vld [vmem:[%s223_s2 + $0x50] sm:$0xff]  ;;  %s132_s25 = smov [#allocation2]   ;;  %s91_s0 = sshll.u32 %s224_s3, 4  ;;  %s92_s0 = int_to_ptr.hbm [resolvable:$true] %s91_s0 }
   0x8   :  { %63 = vmatpush.msra.mxu1 %v56_v6  ;;  %v53_v9 = vld [vmem:[%s223_s2 + $0x48] sm:$0xff]  ;;  %v52_v10 = vld [vmem:[%s223_s2 + $0x40] sm:$0xff]  ;;  %v51_v11 = vld [vmem:[%s223_s2 + $0x38] sm:$0xff]  ;;  %s89_s26 = sshll.u32 %s132_s25, 4  ;;  %vm80_vm1 = vcmask 15360   ;;  %s90_s26 = int_to_ptr.vmem [resolvable:$true] %s89_s26 }
   0x9   :  { %v50_v12 = vld [vmem:[%s223_s2 + $0x30] sm:$0xff]  ;;  %v49_v13 = vld [vmem:[%s223_s2 + $0x28] sm:$0xff]  ;;  %v48_v14 = vld [vmem:[%s223_s2 + $0x20] sm:$0xff] }
   0xa   :  { %64 = vmatpush.msra.mxu1 %v55_v7  ;;  %v47_v15 = vld [vmem:[%s223_s2 + $0x18] sm:$0xff]  ;;  %v46_v16 = vld [vmem:[%s223_s2 + $0x10] sm:$0xff]  ;;  %v45_v17 = vld [vmem:[%s223_s2 + $0x8] sm:$0xff] }
   0xb   :  { %v44_v18 = vld [vmem:[%s223_s2] sm:$0xff] }
   0xc   :  { %65 = vmatpush.msra.mxu1 %v54_v8 }
   0xe   :  { %66 = vmatpush.msra.mxu1 %v53_v9 }
  0x10   :  { %67 = vmatpush.msra.mxu1 %v52_v10 }
  0x12   :  { %68 = vmatpush.msra.mxu1 %v51_v11 }
  0x14   :  { %69 = vmatpush.msra.mxu1 %v50_v12 }
  0x16   :  { %70 = vmatpush.msra.mxu1 %v49_v13 }
  0x18   :  { %71 = vmatpush.msra.mxu1 %v48_v14 }
  0x1a   :  { %72 = vmatpush.msra.mxu1 %v47_v15 }
  0x1c   :  { %73 = vmatpush.msra.mxu1 %v46_v16 }
  0x1e   :  { %74 = vmatpush.msra.mxu1 %v45_v17 }
  0x20   :  { %75 = vmatpush.msra.mxu1 %v44_v18 }
  0x82   :  { %v41_v19 = vpop.f32.mrf.mxu0 }
  0x83   :  { %v82_v20 = vpack.c.bf16 %v41_v19, %v41_v19  ;;  %76 = vmatmul.f32.vlgmr.msra.gmra.mxu1 %v41_v19 }
  0x85   :  { %83 = vst [vmem:[#allocation2] sm:$0xf] %v82_v20 }
  0x86   :  { %94 = dma.vmem_to_hbm [thread:$0]  %s90_s26, 64, %s92_s0, [#allocation3]  }
 0x100   :  { %v77_v21 = vpop.f32.mrf.mxu1 }
 0x101   :  { %81 = vst.msk [vmem:[%s225_s4] sm:$0xff] %vm80_vm1, %v77_v21 }
 0x102   :  { %130 = dma.done.wait [#allocation3], 64  }
 0x103   :  { %131 = vsyncadd [#allocation3], 4294967232 }
 0x104   :  { %103 = vsyncpa [#allocation3], 1 }

</bundles_post_ra>
